<compile_context>
chip_gen: v6e
topology: v6e:2x2x1
jax: 0.10.0
libtpu: 0.0.40
codegen_flags: <defaults>
</compile_context>

<pallas_src>
import functools

import jax
import jax.numpy as jnp
from jax import lax
from jax.experimental import pallas as pl
from jax.experimental.pallas import tpu as pltpu


def _contrastive_loss_kernel(temp_ref, img_ref, txt_ref, out_ref,
                             m_sc, l_sc, d_sc):
    """One (row-block i, col-block j) step of the streaming softmax-CE loss.

    temp_ref : SMEM (1,) f32 temperature
    img_ref  : VMEM (bm, D)  rows i*bm:(i+1)*bm of image_emb
    txt_ref  : VMEM (bm, D)  rows j*bm:(j+1)*bm of text_emb
    out_ref  : VMEM (bm, 1)  per-row (lse - diag); written at the last col step
    m_sc/l_sc/d_sc : VMEM (bm, 1) f32 running max / running sum / diag scratch
    """
    i = pl.program_id(0)
    j = pl.program_id(1)
    inv_temp = 1.0 / temp_ref[0]

    @pl.when(j == 0)
    def _init():
        m_sc[...] = jnp.full_like(m_sc, -jnp.inf)
        l_sc[...] = jnp.zeros_like(l_sc)

    # [bm, bn] logits block: contract the D axis of both operands (no .T materialized),
    # f32 MXU accumulation; apply temperature with a multiply, not a divide.
    s = lax.dot_general(
        img_ref[...], txt_ref[...],
        dimension_numbers=(((1,), (1,)), ((), ())),
        preferred_element_type=jnp.float32,
    ) * inv_temp

    # Online log-sum-exp update across column blocks.
    m_new = jnp.maximum(m_sc[...], jnp.max(s, axis=-1, keepdims=True))
    alpha = jnp.exp(m_sc[...] - m_new)
    p = jnp.exp(s - m_new)
    l_sc[...] = alpha * l_sc[...] + jnp.sum(p, axis=-1, keepdims=True)
    m_sc[...] = m_new

    # Diagonal logits[r, r]: when this col block is the diagonal block, img_ref and
    # txt_ref hold the same global rows, so an O(bm*D) elementwise product suffices.
    @pl.when(j == i)
    def _diag():
        prod = img_ref[...].astype(jnp.float32) * txt_ref[...].astype(jnp.float32)
        d_sc[...] = jnp.sum(prod, axis=-1, keepdims=True) * inv_temp

    @pl.when(j == pl.num_programs(1) - 1)
    def _finalize():
        out_ref[...] = m_sc[...] + jnp.log(l_sc[...]) - d_sc[...]


def _pick_block(B, max_block=256):
    """Largest multiple-of-8 divisor of B that is <= max_block, else B itself."""
    if B <= max_block:
        return B
    start = max_block - (max_block % 8)
    for t in range(start, 7, -8):
        if B % t == 0:
            return t
    return B


@functools.partial(jax.jit, static_argnames=("block_b",))
def contrastive_loss(image_emb, text_emb, temperature, block_b=None):
    """image_emb: [B, D], text_emb: [B, D], temperature: scalar -> scalar loss."""
    B, D = image_emb.shape
    assert text_emb.shape == (B, D)
    bm = _pick_block(B) if block_b is None else block_b
    assert B % bm == 0
    n_row = B // bm
    n_col = B // bm

    temp = jnp.asarray(temperature, jnp.float32).reshape((1,))
    elem_bytes = jnp.dtype(image_emb.dtype).itemsize
    cost = pl.CostEstimate(
        flops=2 * B * B * D + 2 * B * D,
        transcendentals=B * B + 2 * B,
        bytes_accessed=2 * B * D * elem_bytes + B * 4,
    )

    row_loss = pl.pallas_call(
        _contrastive_loss_kernel,
        out_shape=jax.ShapeDtypeStruct((B, 1), jnp.float32),
        grid_spec=pltpu.PrefetchScalarGridSpec(
            num_scalar_prefetch=0,
            grid=(n_row, n_col),
            in_specs=[
                pl.BlockSpec(memory_space=pltpu.SMEM),              # temperature
                pl.BlockSpec((bm, D), lambda i, j: (i, 0)),         # image rows
                pl.BlockSpec((bm, D), lambda i, j: (j, 0)),         # text rows (cols of logits)
            ],
            out_specs=pl.BlockSpec((bm, 1), lambda i, j: (i, 0)),
            scratch_shapes=[
                pltpu.VMEM((bm, 1), jnp.float32),   # running max
                pltpu.VMEM((bm, 1), jnp.float32),   # running sum
                pltpu.VMEM((bm, 1), jnp.float32),   # diagonal logits
            ],
        ),
        compiler_params=pltpu.CompilerParams(
            dimension_semantics=("parallel", "arbitrary")),
        cost_estimate=cost,
    )(temp, image_emb, text_emb)

    return jnp.mean(row_loss[:, 0])


if __name__ == "__main__":
    key = jax.random.PRNGKey(0)
    k_img, k_txt = jax.random.split(key)

    B, D = 128, 64  # small paired image/text embedding batch; 4x4 tile grid below
    image_emb = 0.1 * jax.random.normal(k_img, (B, D), dtype=jnp.float32)
    text_emb = 0.1 * jax.random.normal(k_txt, (B, D), dtype=jnp.float32)

    # Deterministic parameter init, matching nn.Parameter(torch.tensor(0.2))
    temperature = jnp.float32(0.2)

    loss = contrastive_loss(image_emb, text_emb, temperature, block_b=32)
    jax.block_until_ready(loss)

    # Pure-JAX reference check (CrossEntropyLoss with labels = arange(B))
    logits_ref = jnp.matmul(image_emb, text_emb.T,
                            precision=jax.lax.Precision.HIGHEST) / temperature
    ref = jnp.mean(jax.nn.logsumexp(logits_ref, axis=-1) - jnp.diag(logits_ref))
    assert jnp.allclose(loss, ref, atol=1e-4, rtol=1e-4), (loss, ref)

    print("KERNEL_OK")
</pallas_src>

<mosaic_0001>
module attributes {stable_mosaic.version = 11 : i64} {
  func.func @_contrastive_loss_kernel(%arg0: i32, %arg1: i32, %arg2: memref<1xf32, #tpu.memory_space<smem>>, %arg3: memref<32x64xf32, #tpu.memory_space<vmem>>, %arg4: memref<32x64xf32, #tpu.memory_space<vmem>>, %arg5: memref<32x1xf32, #tpu.memory_space<vmem>>, %arg6: memref<32x1xf32, #tpu.memory_space<vmem>>, %arg7: memref<32x1xf32, #tpu.memory_space<vmem>>, %arg8: memref<32x1xf32, #tpu.memory_space<vmem>>) attributes {dimension_semantics = [#tpu.dimension_semantics<parallel>, #tpu.dimension_semantics<arbitrary>], iteration_bounds = array<i64: 4, 4>, scalar_prefetch = 0 : i64, scratch_operands = 3 : i64, tpu.core_type = #tpu.core_type<tc>, window_params = [{transform_indices = @transform_0, window_bounds = array<i64: 1>}, {transform_indices = @transform_1, window_bounds = array<i64: 32, 64>}, {transform_indices = @transform_2, window_bounds = array<i64: 32, 64>}, {transform_indices = @transform_3, window_bounds = array<i64: 32, 1>}]} {
    %c0 = arith.constant 0 : index
    %0 = memref.load %arg2[%c0] : memref<1xf32, #tpu.memory_space<smem>>
    %cst = arith.constant 1.000000e+00 : f32
    %1 = arith.divf %cst, %0 : f32
    %c0_i32 = arith.constant 0 : i32
    %2 = arith.cmpi eq, %arg1, %c0_i32 : i32
    %3 = arith.extui %2 : i1 to i32
    %c0_i32_0 = arith.constant 0 : i32
    %4 = arith.cmpi ne, %3, %c0_i32_0 : i32
    scf.if %4 {
      %cst_20 = arith.constant 0xFF800000 : f32
      %33 = vector.broadcast %cst_20 : f32 to vector<32x1xf32>
      %c0_21 = arith.constant 0 : index
      %c0_22 = arith.constant 0 : index
      %34 = vector.load %arg6[%c0_21, %c0_22] : memref<32x1xf32, #tpu.memory_space<vmem>>, vector<32x1xf32>
      tpu.vector_store %arg6[%c0_21, %c0_22], %33 {strides = array<i32>} : memref<32x1xf32, #tpu.memory_space<vmem>>, vector<32x1xf32>,
      %cst_23 = arith.constant 0.000000e+00 : f32
      %35 = vector.broadcast %cst_23 : f32 to vector<32x1xf32>
      %c0_24 = arith.constant 0 : index
      %c0_25 = arith.constant 0 : index
      %36 = vector.load %arg7[%c0_24, %c0_25] : memref<32x1xf32, #tpu.memory_space<vmem>>, vector<32x1xf32>
      tpu.vector_store %arg7[%c0_24, %c0_25], %35 {strides = array<i32>} : memref<32x1xf32, #tpu.memory_space<vmem>>, vector<32x1xf32>,
    } else {
    }
    %c0_1 = arith.constant 0 : index
    %c0_2 = arith.constant 0 : index
    %5 = vector.load %arg3[%c0_1, %c0_2] : memref<32x64xf32, #tpu.memory_space<vmem>>, vector<32x64xf32>
    %c0_3 = arith.constant 0 : index
    %c0_4 = arith.constant 0 : index
    %6 = vector.load %arg4[%c0_3, %c0_4] : memref<32x64xf32, #tpu.memory_space<vmem>>, vector<32x64xf32>
    %cst_5 = arith.constant dense<0.000000e+00> : vector<32x32xf32>
    %7 = tpu.matmul %5, %6, %cst_5 {dimension_numbers = #tpu.dot_dimension_numbers<[1], [1], [0], [0], [0, 0, 1, 0], [], []>} : vector<32x64xf32>, vector<32x64xf32>, vector<32x32xf32> -> vector<32x32xf32>
    %8 = vector.broadcast %1 : f32 to vector<32x32xf32>
    %9 = arith.mulf %7, %8 : vector<32x32xf32>
    %c0_6 = arith.constant 0 : index
    %c0_7 = arith.constant 0 : index
    %10 = vector.load %arg6[%c0_6, %c0_7] : memref<32x1xf32, #tpu.memory_space<vmem>>, vector<32x1xf32>
    %cst_8 = arith.constant dense<0xFF800000> : vector<32xf32>
    %11 = vector.multi_reduction <maximumf>, %9, %cst_8 [1] : vector<32x32xf32> to vector<32xf32>
    %12 = vector.shape_cast %11 : vector<32xf32> to vector<32x1xf32>
    %13 = arith.maximumf %10, %12 : vector<32x1xf32>
    %c0_9 = arith.constant 0 : index
    %c0_10 = arith.constant 0 : index
    %14 = vector.load %arg6[%c0_9, %c0_10] : memref<32x1xf32, #tpu.memory_space<vmem>>, vector<32x1xf32>
    %15 = arith.subf %14, %13 : vector<32x1xf32>
    %16 = math.exp %15 : vector<32x1xf32>
    %17 = vector.broadcast %13 : vector<32x1xf32> to vector<32x32xf32>
    %18 = arith.subf %9, %17 : vector<32x32xf32>
    %19 = math.exp %18 : vector<32x32xf32>
    %c0_11 = arith.constant 0 : index
    %c0_12 = arith.constant 0 : index
    %20 = vector.load %arg7[%c0_11, %c0_12] : memref<32x1xf32, #tpu.memory_space<vmem>>, vector<32x1xf32>
    %21 = arith.mulf %16, %20 : vector<32x1xf32>
    %cst_13 = arith.constant dense<0.000000e+00> : vector<32xf32>
    %22 = vector.multi_reduction <add>, %19, %cst_13 [1] : vector<32x32xf32> to vector<32xf32>
    %23 = vector.shape_cast %22 : vector<32xf32> to vector<32x1xf32>
    %24 = arith.addf %21, %23 : vector<32x1xf32>
    %c0_14 = arith.constant 0 : index
    %c0_15 = arith.constant 0 : index
    %25 = vector.load %arg7[%c0_14, %c0_15] : memref<32x1xf32, #tpu.memory_space<vmem>>, vector<32x1xf32>
    tpu.vector_store %arg7[%c0_14, %c0_15], %24 {strides = array<i32>} : memref<32x1xf32, #tpu.memory_space<vmem>>, vector<32x1xf32>,
    %c0_16 = arith.constant 0 : index
    %c0_17 = arith.constant 0 : index
    %26 = vector.load %arg6[%c0_16, %c0_17] : memref<32x1xf32, #tpu.memory_space<vmem>>, vector<32x1xf32>
    tpu.vector_store %arg6[%c0_16, %c0_17], %13 {strides = array<i32>} : memref<32x1xf32, #tpu.memory_space<vmem>>, vector<32x1xf32>,
    %27 = arith.cmpi eq, %arg1, %arg0 : i32
    %28 = arith.extui %27 : i1 to i32
    %c0_i32_18 = arith.constant 0 : i32
    %29 = arith.cmpi ne, %28, %c0_i32_18 : i32
    scf.if %29 {
      %c0_20 = arith.constant 0 : index
      %c0_21 = arith.constant 0 : index
      %33 = vector.load %arg3[%c0_20, %c0_21] : memref<32x64xf32, #tpu.memory_space<vmem>>, vector<32x64xf32>
      %c0_22 = arith.constant 0 : index
      %c0_23 = arith.constant 0 : index
      %34 = vector.load %arg4[%c0_22, %c0_23] : memref<32x64xf32, #tpu.memory_space<vmem>>, vector<32x64xf32>
      %35 = arith.mulf %33, %34 : vector<32x64xf32>
      %cst_24 = arith.constant dense<0.000000e+00> : vector<32xf32>
      %36 = vector.multi_reduction <add>, %35, %cst_24 [1] : vector<32x64xf32> to vector<32xf32>
      %37 = vector.shape_cast %36 : vector<32xf32> to vector<32x1xf32>
      %38 = vector.broadcast %1 : f32 to vector<32x1xf32>
      %39 = arith.mulf %37, %38 : vector<32x1xf32>
      %c0_25 = arith.constant 0 : index
      %c0_26 = arith.constant 0 : index
      %40 = vector.load %arg8[%c0_25, %c0_26] : memref<32x1xf32, #tpu.memory_space<vmem>>, vector<32x1xf32>
      tpu.vector_store %arg8[%c0_25, %c0_26], %39 {strides = array<i32>} : memref<32x1xf32, #tpu.memory_space<vmem>>, vector<32x1xf32>,
    } else {
    }
    %c3_i32 = arith.constant 3 : i32
    %30 = arith.cmpi eq, %arg1, %c3_i32 : i32
    %31 = arith.extui %30 : i1 to i32
    %c0_i32_19 = arith.constant 0 : i32
    %32 = arith.cmpi ne, %31, %c0_i32_19 : i32
    scf.if %32 {
      %c0_20 = arith.constant 0 : index
      %c0_21 = arith.constant 0 : index
      %33 = vector.load %arg6[%c0_20, %c0_21] : memref<32x1xf32, #tpu.memory_space<vmem>>, vector<32x1xf32>
      %c0_22 = arith.constant 0 : index
      %c0_23 = arith.constant 0 : index
      %34 = vector.load %arg7[%c0_22, %c0_23] : memref<32x1xf32, #tpu.memory_space<vmem>>, vector<32x1xf32>
      %35 = math.log %34 : vector<32x1xf32>
      %36 = arith.addf %33, %35 : vector<32x1xf32>
      %c0_24 = arith.constant 0 : index
      %c0_25 = arith.constant 0 : index
      %37 = vector.load %arg8[%c0_24, %c0_25] : memref<32x1xf32, #tpu.memory_space<vmem>>, vector<32x1xf32>
      %38 = arith.subf %36, %37 : vector<32x1xf32>
      %c0_26 = arith.constant 0 : index
      %c0_27 = arith.constant 0 : index
      %39 = vector.load %arg5[%c0_26, %c0_27] : memref<32x1xf32, #tpu.memory_space<vmem>>, vector<32x1xf32>
      tpu.vector_store %arg5[%c0_26, %c0_27], %38 {strides = array<i32>} : memref<32x1xf32, #tpu.memory_space<vmem>>, vector<32x1xf32>,
    } else {
    }
    return
  }
  func.func @transform_0(%arg0: i32, %arg1: i32) -> i32 {
    %c0_i32 = arith.constant 0 : i32
    %c0_i32_0 = arith.constant 0 : i32
    return %c0_i32 : i32
  }
  func.func @transform_1(%arg0: i32, %arg1: i32) -> (i32, i32) {
    %c0_i32 = arith.constant 0 : i32
    %c0_i32_0 = arith.constant 0 : i32
    return %arg0, %c0_i32 : i32, i32
  }
  func.func @transform_2(%arg0: i32, %arg1: i32) -> (i32, i32) {
    %c0_i32 = arith.constant 0 : i32
    %c0_i32_0 = arith.constant 0 : i32
    return %arg1, %c0_i32 : i32, i32
  }
  func.func @transform_3(%arg0: i32, %arg1: i32) -> (i32, i32) {
    %c0_i32 = arith.constant 0 : i32
    %c0_i32_0 = arith.constant 0 : i32
    return %arg0, %c0_i32 : i32, i32
  }
}

</mosaic_0001>

<bundles_post_ra>
// kernel: contrastive_loss.1
= control target key start
LH: loop header
LB: loop body
LE: loop exit
PB: predicated region body
PF: predicated region fallthrough
CT: control target
= control target key end

     0   :  { %s792_s14 = smov 0   ;;  %s794_s15 = smov 0   ;;  %s943_s0 = inlined_call_operand.<no memory space> [shape: f32[1], index: 0, kind: input, shape index: {}]   ;;  %s944_s1 = inlined_call_operand.vmem [shape: f32[128,64], index: 1, kind: input, shape index: {}]   ;;  %s945_s2 = inlined_call_operand.vmem [shape: f32[128,64], index: 2, kind: input, shape index: {}]   ;;  %s946_s3 = inlined_call_operand.vmem [shape: f32[128,1], index: 3, kind: output, shape index: {}]  }
   0x1   :  { %8 = sst [smem:[#allocation5]] %s943_s0  ;;  %s796_s16 = smov 0  }
   0x2   :  { %s798_s17 = smov 0   ;;  %s800_s18 = smov 0  }
   0x3 LB: > { %s23_s0 = sadd.s32 1, %s756_s16  ;;  %s26_s19 = sadd.s32 1, %s760_s17  ;;  %s764_s18 = sphi %s800_s18, %s14_s18   ;;  %s760_s17 = sphi %s798_s17, %s950_s17   ;;  %s756_s16 = sphi %s796_s16, %s949_s16   ;;  %s752_s15 = sphi %s794_s15, %s948_s15   ;;  %s748_s14 = sphi %s792_s14, %s947_s14  }
   0x4   : > { %p24_p0 = scmp.ge.s32.totalorder %s23_s0, 4  ;;  %p603_p1 = scmp.ge.s32.totalorder %s764_s18, 1 }
   0x5   : > { %p162_p2 = scmp.lt.s32.totalorder %s764_s18, 17 }
   0x6   : > { %s952_s0 = smov (%p24_p0, %s23_s0), 0  ;;  %s954_s19 = smov (!%p24_p0, %s26_s19), %s760_s17 }
   0x7   : > { %p163_p3 = pnand %p603_p1, %p162_p2  ;;  %p28_p4 = scmp.ge.s32.totalorder %s954_s19, 4 }
   0x8   : > { %s604_s20 = sshll.u32 (!%p163_p3), %s752_s15, 2  ;;  %s606_s21 = sshll.u32 (!%p163_p3), %s748_s14, 2 }
   0x9   : > { %s956_s19 = smov (%p28_p4, %s954_s19), 0  ;;  %166 = sbr.rel (%p163_p3) target bundleno = 920 (0x398), region = 32 }
   0xa   : > { %p192_p5 = scmp.lt.s32.totalorder (!%p163_p3), %s604_s20, 15  ;;  %p198_p6 = scmp.lt.s32.totalorder (!%p163_p3), %s606_s21, 15 }
   0xb   : > { %s209_s22 = sld [smem:[#allocation5]] (!%p163_p3)  ;;  %p610_p7 = scmp.ne.s32.totalorder (!%p163_p3), %s748_s14, 0 }
   0xe   : > { %s958_s20 = smov (!%p192_p5, %s604_s20), 15  ;;  %s960_s21 = smov (!%p198_p6, %s606_s21), 15 }
   0xf   : > { %s605_s23 = sshll.u32 %s958_s20, 3  ;;  %s607_s27 = sshll.u32 %s960_s21, 3 }
  0x10   : > { %s831_s26 = scalar_lea.vmem %s944_s1, %s605_s23  ;;  %s836_s30 = scalar_lea.vmem %s945_s2, %s607_s27 }
  0x11   : > { %s841_s6 = scalar_lea.vmem %s946_s3, %s605_s23  ;;  %v210_v0 = vstv %s209_s22 }
  0x12   : > { %698 = vrcp.f32 %v210_v0 }
  0x1f   : > { %v699_v1 = vpop.eup %698 }
  0x20   : > { %653 = vpush %v699_v1 }
  0x4d   : > { %216 = sbr.rel (%p610_p7) target bundleno = 87 (0x57), region = 36 }
  0x51   : > { %s843_s7 = spop %653 }
  0x52   : > { %vm217_vm0 = vcmask 7168   ;;  %v766_v2 = vmov -inf   ;;  %v767_v3 = vmov 0.0  }
  0x53   : > { %218 = vst.msk [vmem:[#allocation2] sm:$0xff] %vm217_vm0, %v766_v2  ;;  %219 = vst.msk [vmem:[#allocation2 + $0x8] sm:$0xff] %vm217_vm0, %v766_v2 }
  0x54   : > { %220 = vst.msk [vmem:[#allocation2 + $0x10] sm:$0xff] %vm217_vm0, %v766_v2  ;;  %221 = vst.msk [vmem:[#allocation2 + $0x18] sm:$0xff] %vm217_vm0, %v766_v2 }
  0x55   : > { %222 = vst.msk [vmem:[#allocation3] sm:$0xff] %vm217_vm0, %v767_v3  ;;  %223 = vst.msk [vmem:[#allocation3 + $0x8] sm:$0xff] %vm217_vm0, %v767_v3 }
  0x56   : > { %224 = vst.msk [vmem:[#allocation3 + $0x10] sm:$0xff] %vm217_vm0, %v767_v3  ;;  %225 = vst.msk [vmem:[#allocation3 + $0x18] sm:$0xff] %vm217_vm0, %v767_v3 }
  0x57 PF: > { %v233_v4 = vld [vmem:[%s836_s30 + $0x18] sm:$0xff]  ;;  %vm234_vm1 = vcmask 523264   ;;  %v232_v5 = vld [vmem:[%s836_s30 + $0x10] sm:$0xff]  ;;  %v226_v6 = vld [vmem:[%s831_s26] sm:$0xff]  ;;  %v875_v14 = vstv %s843_s7  ;;  %vm353_vm2 = vcmask 261120   ;;  %v768_v25 = vmov 0   ;;  %p619_p8 = scmp.ne.s32.totalorder %s748_s14, %s752_s15 }
  0x58   : > { %631 = vmatprep.subr.msk.mxu0 %vm234_vm1, %v233_v4  ;;  %645 = vmatprep.subr.msk.mxu1 %vm234_vm1, %v233_v4  ;;  %v228_v7 = vld [vmem:[%s831_s26 + $0x10] sm:$0xff]  ;;  %v231_v8 = vld [vmem:[%s836_s30 + $0x8] sm:$0xff]  ;;  %v230_v9 = vld [vmem:[%s836_s30] sm:$0xff]  ;;  %vm438_vm3 = vcmask 7168  }
  0x59   : > { %632 = vmatpush3.xpose.msk.msra.mxu0 %vm234_vm1, %v233_v4  ;;  %649 = vmatpush3.xpose.msk.msra.mxu1 %vm234_vm1, %v233_v4  ;;  %v227_v10 = vld [vmem:[%s831_s26 + $0x8] sm:$0xff]  ;;  %v229_v11 = vld [vmem:[%s831_s26 + $0x18] sm:$0xff] }
  0x5a   : > { %633 = vmatprep.subr.msk.mxu0 %vm234_vm1, %v232_v5  ;;  %646 = vmatprep.subr.msk.mxu1 %vm234_vm1, %v232_v5  ;;  %v349_v26 = vld [vmem:[#allocation2] sm:$0xff]  ;;  %v350_v32 = vld [vmem:[#allocation2 + $0x8] sm:$0xff] }
  0x5b   : > { %639 = vmatprep.mubr.msk.f32.mxu0 %vm234_vm1, %v226_v6  ;;  %642 = vmatprep.mubr.msk.f32.mxu1 %vm234_vm1, %v228_v7  ;;  %v351_v27 = vld [vmem:[#allocation2 + $0x10] sm:$0xff]  ;;  %v352_v33 = vld [vmem:[#allocation2 + $0x18] sm:$0xff] }
  0x5c   : > { %700 = vset.pattern.permute.xlu0 %v768_v25  ;;  %701 = vset.pattern.permute.xlu1 %v768_v25  ;;  %v414_v3 = vld [vmem:[#allocation3] sm:$0xff]  ;;  %v415_v7 = vld [vmem:[#allocation3 + $0x8] sm:$0xff] }
  0x5d   : > { %634 = vmatpush3.xpose.msk.msra.mxu0 %vm234_vm1, %v232_v5  ;;  %650 = vmatpush3.xpose.msk.msra.mxu1 %vm234_vm1, %v232_v5 }
  0x5e   : > { %635 = vmatprep.subr.msk.mxu0 %vm234_vm1, %v231_v8  ;;  %647 = vmatprep.subr.msk.mxu1 %vm234_vm1, %v231_v8 }
  0x61   : > { %636 = vmatpush3.xpose.msk.msra.mxu0 %vm234_vm1, %v231_v8  ;;  %651 = vmatpush3.xpose.msk.msra.mxu1 %vm234_vm1, %v231_v8 }
  0x62   : > { %637 = vmatprep.subr.msk.mxu0 %vm234_vm1, %v230_v9  ;;  %648 = vmatprep.subr.msk.mxu1 %vm234_vm1, %v230_v9 }
  0x65   : > { %638 = vmatpush3.xpose.msk.msra.mxu0 %vm234_vm1, %v230_v9  ;;  %652 = vmatpush3.xpose.msk.msra.mxu1 %vm234_vm1, %v230_v9 }
  0x68   : > { %640 = vmatmul.mubr.msk.f32.vlgmr.msra.gmra.mxu0 %vm234_vm1, %v227_v10  ;;  %643 = vmatmul.mubr.msk.f32.vlgmr.msra.gmra.mxu1 %vm234_vm1, %v229_v11 }
 0x128   : > { %v641_v12 = vpop.f32.mrf.mxu0  ;;  %v644_v13 = vpop.f32.mrf.mxu1 }
 0x129   : > { %v348_v18 = vmul.f32 %v644_v13, %v875_v14  ;;  %v346_v20 = vmul.f32 %v641_v12, %v875_v14  ;;  %v416_v12 = vld [vmem:[#allocation3 + $0x10] sm:$0xff] }
 0x12a   : > { %v325_v15 = vpop.f32.mrf.mxu0  ;;  %v335_v16 = vpop.f32.mrf.mxu1 }
 0x12b   : > { %v345_v17 = vmul.f32 %v875_v14, %v325_v15  ;;  %v347_v19 = vmul.f32 %v875_v14, %v335_v16  ;;  %v363_v23 = vsel %vm353_vm2, %v348_v18, -inf  ;;  %v357_v24 = vsel %vm353_vm2, %v346_v20, -inf }
 0x12d   : > { %v354_v21 = vsel %vm353_vm2, %v345_v17, -inf  ;;  %v360_v22 = vsel %vm353_vm2, %v347_v19, -inf }
 0x12e   : > { %355 = vmax.xlane.f32.xlu0 %v354_v21  ;;  %361 = vmax.xlane.f32.xlu1 %v360_v22 }
 0x132   : > { %358 = vmax.xlane.f32.xlu0 %v357_v24  ;;  %364 = vmax.xlane.f32.xlu1 %v363_v23 }
 0x1b7   : > { %v356_v28 = vpop.xlane.xlu0 %355  ;;  %v362_v29 = vpop.xlane.xlu1 %361 }
 0x1b8   : > { %v366_v30 = vmax.f32 %v349_v26, %v356_v28  ;;  %v368_v31 = vmax.f32 %v351_v27, %v362_v29 }
 0x1ba   : > { %v370_v34 = vsub.f32 %v349_v26, %v366_v30  ;;  %443 = vst.msk [vmem:[#allocation2] sm:$0xff] %vm438_vm3, %v366_v30  ;;  %v372_v35 = vsub.f32 %v351_v27, %v368_v31  ;;  %445 = vst.msk [vmem:[#allocation2 + $0x10] sm:$0xff] %vm438_vm3, %v368_v31  ;;  %384 = vperm.xlu0 %700, %v366_v30  }
 0x1bb   : > { %v359_v36 = vpop.xlane.xlu0 %358  ;;  %v365_v37 = vpop.xlane.xlu1 %364 }
 0x1bc   : > { %v367_v38 = vmax.f32 %v350_v32, %v359_v36  ;;  %v369_v39 = vmax.f32 %v352_v33, %v365_v37  ;;  %v374_v62 = vmul.f32 1.442695, %v370_v34  ;;  %v378_v0 = vmul.f32 1.442695, %v372_v35 }
 0x1be   : > { %v371_v40 = vsub.f32 %v350_v32, %v367_v38  ;;  %444 = vst.msk [vmem:[#allocation2 + $0x8] sm:$0xff] %vm438_vm3, %v367_v38  ;;  %v373_v41 = vsub.f32 %v352_v33, %v369_v39  ;;  %446 = vst.msk [vmem:[#allocation2 + $0x18] sm:$0xff] %vm438_vm3, %v369_v39  ;;  %389 = vperm.xlu1 %701, %v367_v38  }
 0x1c0   : > { %v376_v63 = vmul.f32 1.442695, %v371_v40  ;;  %v380_v1 = vmul.f32 1.442695, %v373_v41 }
 0x1c2   : > { %394 = vperm.xlu1 %701, %v368_v31  }
 0x1c6   : > { %399 = vperm.xlu1 %701, %v369_v39  }
 0x235   : > { %v385_v42 = vpop.permute.xlu0 %384 }
 0x236   : > { %v402_v43 = vsub.f32 %v345_v17, %v385_v42 }
 0x238   : > { %v406_v44 = vmul.f32 1.442695, %v402_v43 }
 0x239   : > { %v390_v45 = vpop.permute.xlu1 %389 }
 0x23a   : > { %702 = vpow2.f32 %v406_v44  ;;  %v403_v46 = vsub.f32 %v346_v20, %v390_v45 }
 0x23c   : > { %v408_v47 = vmul.f32 1.442695, %v403_v46 }
 0x23d   : > { %v395_v48 = vpop.permute.xlu1 %394 }
 0x23e   : > { %704 = vpow2.f32 %v408_v47  ;;  %v404_v49 = vsub.f32 %v347_v19, %v395_v48 }
 0x240   : > { %v410_v50 = vmul.f32 1.442695, %v404_v49 }
 0x241   : > { %v400_v51 = vpop.permute.xlu1 %399 }
 0x242   : > { %706 = vpow2.f32 %v410_v50  ;;  %v405_v52 = vsub.f32 %v348_v18, %v400_v51  ;;  %v417_v18 = vld [vmem:[#allocation3 + $0x18] sm:$0xff] }
 0x244   : > { %v412_v53 = vmul.f32 1.442695, %v405_v52 }
 0x246   : > { %708 = vpow2.f32 %v412_v53 }
 0x247   : > { %v703_v54 = vpop.eup %702  ;;  %710 = vpow2.f32 %v374_v62 }
 0x248   : > { %v422_v55 = vsel %vm353_vm2, %v703_v54, 0.0  ;;  %712 = vpow2.f32 %v376_v63 }
 0x249   : > { %423 = vadd.xlane.f32.xlu1 %v422_v55  ;;  %714 = vpow2.f32 %v378_v0 }
 0x24a   : > { %716 = vpow2.f32 %v380_v1 }
 0x24b   : > { %v705_v56 = vpop.eup %704 }
 0x24c   : > { %v425_v57 = vsel %vm353_vm2, %v705_v56, 0.0 }
 0x24d   : > { %426 = vadd.xlane.f32.xlu0 %v425_v57 }
 0x24f   : > { %v707_v58 = vpop.eup %706 }
 0x250   : > { %v428_v59 = vsel %vm353_vm2, %v707_v58, 0.0 }
 0x251   : > { %429 = vadd.xlane.f32.xlu1 %v428_v59 }
 0x253   : > { %v709_v60 = vpop.eup %708 }
 0x254   : > { %v431_v61 = vsel %vm353_vm2, %v709_v60, 0.0  ;;  %v711_v2 = vpop.eup %710 }
 0x255   : > { %432 = vadd.xlane.f32.xlu1 %v431_v61  ;;  %v418_v4 = vmul.f32 %v711_v2, %v414_v3  ;;  %v713_v5 = vpop.eup %712 }
 0x256   : > { %v419_v9 = vmul.f32 %v713_v5, %v415_v7  ;;  %v715_v10 = vpop.eup %714 }
 0x257   : > { %v420_v15 = vmul.f32 %v715_v10, %v416_v12  ;;  %v717_v16 = vpop.eup %716 }
 0x258   : > { %v421_v20 = vmul.f32 %v717_v16, %v417_v18 }
 0x2d2   : > { %v424_v6 = vpop.xlane.xlu1 %423 }
 0x2d3   : > { %v434_v8 = vadd.f32 %v424_v6, %v418_v4 }
 0x2d5   : > { %439 = vst.msk [vmem:[#allocation3] sm:$0xff] %vm438_vm3, %v434_v8 }
 0x2d6   : > { %v427_v11 = vpop.xlane.xlu0 %426 }
 0x2d7   : > { %v435_v13 = vadd.f32 %v427_v11, %v419_v9 }
 0x2d9   : > { %440 = vst.msk [vmem:[#allocation3 + $0x8] sm:$0xff] %vm438_vm3, %v435_v13 }
 0x2da   : > { %v430_v17 = vpop.xlane.xlu1 %429 }
 0x2db   : > { %v436_v19 = vadd.f32 %v430_v17, %v420_v15 }
 0x2dd   : > { %441 = vst.msk [vmem:[#allocation3 + $0x10] sm:$0xff] %vm438_vm3, %v436_v19  ;;  %450 = sbr.rel (%p619_p8) target bundleno = 888 (0x378), region = 40 }
 0x2de   : > { %v433_v21 = vpop.xlane.xlu1 %432 }
 0x2df   : > { %v437_v22 = vadd.f32 %v433_v21, %v421_v20 }
 0x2e1   : > { %442 = vst.msk [vmem:[#allocation3 + $0x18] sm:$0xff] %vm438_vm3, %v437_v22 }
 0x2e2   : > { %v453_v23 = vld [vmem:[%s831_s26 + $0x10] sm:$0xff]  ;;  %v451_v25 = vld [vmem:[%s831_s26] sm:$0xff]  ;;  %v454_v28 = vld [vmem:[%s831_s26 + $0x18] sm:$0xff] }
 0x2e3   : > { %v457_v24 = vld [vmem:[%s836_s30 + $0x10] sm:$0xff]  ;;  %v455_v27 = vld [vmem:[%s836_s30] sm:$0xff]  ;;  %v458_v29 = vld [vmem:[%s836_s30 + $0x18] sm:$0xff] }
 0x2e4   : > { %v461_v26 = vmul.f32 %v457_v24, %v453_v23  ;;  %v459_v30 = vmul.f32 %v455_v27, %v451_v25  ;;  %v462_v31 = vmul.f32 %v458_v29, %v454_v28  ;;  %v452_v32 = vld [vmem:[%s831_s26 + $0x8] sm:$0xff] }
 0x2e5   : > { %v456_v33 = vld [vmem:[%s836_s30 + $0x8] sm:$0xff] }
 0x2e6   : > { %v469_v34 = vsel %vm234_vm1, %v461_v26, 0.0  ;;  %v460_v35 = vmul.f32 %v456_v33, %v452_v32  ;;  %v463_v36 = vsel %vm234_vm1, %v459_v30, 0.0  ;;  %v472_v37 = vsel %vm234_vm1, %v462_v31, 0.0 }
 0x2e7   : > { %470 = vadd.xlane.f32.xlu1 %v469_v34  ;;  %464 = vadd.xlane.f32.xlu0 %v463_v36 }
 0x2e8   : > { %v466_v38 = vsel %vm234_vm1, %v460_v35, 0.0 }
 0x2eb   : > { %473 = vadd.xlane.f32.xlu1 %v472_v37  ;;  %467 = vadd.xlane.f32.xlu0 %v466_v38 }
 0x370   : > { %v471_v39 = vpop.xlane.xlu1 %470  ;;  %v465_v41 = vpop.xlane.xlu0 %464 }
 0x371   : > { %v477_v40 = vmul.f32 %v471_v39, %v875_v14  ;;  %v475_v42 = vmul.f32 %v465_v41, %v875_v14 }
 0x373   : > { %481 = vst.msk [vmem:[#allocation4 + $0x10] sm:$0xff] %vm438_vm3, %v477_v40  ;;  %479 = vst.msk [vmem:[#allocation4] sm:$0xff] %vm438_vm3, %v475_v42 }
 0x374   : > { %v474_v43 = vpop.xlane.xlu1 %473  ;;  %v468_v45 = vpop.xlane.xlu0 %467 }
 0x375   : > { %v478_v44 = vmul.f32 %v474_v43, %v875_v14  ;;  %v476_v46 = vmul.f32 %v468_v45, %v875_v14 }
 0x377   : > { %482 = vst.msk [vmem:[#allocation4 + $0x18] sm:$0xff] %vm438_vm3, %v478_v44  ;;  %480 = vst.msk [vmem:[#allocation4 + $0x8] sm:$0xff] %vm438_vm3, %v476_v46 }
 0x378 PF: > { %p620_p9 = scmp.ne.s32.totalorder %s748_s14, 3 }
 0x37a   : > { %486 = sbr.rel (%p620_p9) target bundleno = 920 (0x398), region = 44 }
 0x37f   : > { %v491_v47 = vld [vmem:[#allocation3] sm:$0xff]  ;;  %v492_v48 = vld [vmem:[#allocation3 + $0x8] sm:$0xff]  ;;  %v493_v49 = vld [vmem:[#allocation3 + $0x10] sm:$0xff] }
 0x380   : > { %718 = vlog2.f32 %v491_v47  ;;  %v494_v50 = vld [vmem:[#allocation3 + $0x18] sm:$0xff]  ;;  %v487_v52 = vld [vmem:[#allocation2] sm:$0xff]  ;;  %v488_v54 = vld [vmem:[#allocation2 + $0x8] sm:$0xff] }
 0x381   : > { %720 = vlog2.f32 %v492_v48  ;;  %v507_v56 = vld [vmem:[#allocation4] sm:$0xff]  ;;  %v489_v58 = vld [vmem:[#allocation2 + $0x10] sm:$0xff]  ;;  %v508_v61 = vld [vmem:[#allocation4 + $0x8] sm:$0xff] }
 0x382   : > { %722 = vlog2.f32 %v493_v49  ;;  %v490_v63 = vld [vmem:[#allocation2 + $0x18] sm:$0xff]  ;;  %v509_v1 = vld [vmem:[#allocation4 + $0x10] sm:$0xff] }
 0x383   : > { %724 = vlog2.f32 %v494_v50  ;;  %v510_v5 = vld [vmem:[#allocation4 + $0x18] sm:$0xff] }
 0x38d   : > { %v719_v51 = vpop.eup %718 }
 0x38e   : > { %v721_v53 = vpop.eup %720  ;;  %v496_v14 = vmul.f32 0.6931472, %v719_v51 }
 0x38f   : > { %v723_v55 = vpop.eup %722  ;;  %v498_v57 = vmul.f32 0.6931472, %v721_v53 }
 0x390   : > { %v725_v59 = vpop.eup %724  ;;  %v503_v60 = vadd.f32 %v496_v14, %v487_v52  ;;  %v500_v62 = vmul.f32 0.6931472, %v723_v55 }
 0x391   : > { %v504_v0 = vadd.f32 %v498_v57, %v488_v54  ;;  %v502_v2 = vmul.f32 0.6931472, %v725_v59 }
 0x392   : > { %v511_v3 = vsub.f32 %v503_v60, %v507_v56  ;;  %v505_v4 = vadd.f32 %v500_v62, %v489_v58 }
 0x393   : > { %v512_v6 = vsub.f32 %v504_v0, %v508_v61  ;;  %v506_v7 = vadd.f32 %v502_v2, %v490_v63 }
 0x394   : > { %515 = vst.msk [vmem:[%s841_s6] sm:$0xff] %vm438_vm3, %v511_v3  ;;  %v513_v8 = vsub.f32 %v505_v4, %v509_v1 }
 0x395   : > { %516 = vst.msk [vmem:[%s841_s6 + $0x8] sm:$0xff] %vm438_vm3, %v512_v6  ;;  %v514_v9 = vsub.f32 %v506_v7, %v510_v5 }
 0x396   : > { %517 = vst.msk [vmem:[%s841_s6 + $0x10] sm:$0xff] %vm438_vm3, %v513_v8 }
 0x397   : > { %518 = vst.msk [vmem:[%s841_s6 + $0x18] sm:$0xff] %vm438_vm3, %v514_v9 }
 0x398 PF: > { %s14_s18 = sadd.s32 1, %s764_s18   ;;  %s947_s14 = smov %s756_s16 }
 0x399   : > { %p11_p10 = scmp.ge.s32.totalorder %s14_s18, 18   ;;  %s948_s15 = smov %s760_s17 }
 0x39a   : > { %s949_s16 = smov %s952_s0  ;;  %s950_s17 = smov %s956_s19 }
 0x39b   :  { %13 = sbr.rel (!%p11_p10) target bundleno = 3 (0x3), region = 77 }

</bundles_post_ra>
